<compile_context>
chip_gen: v6e
topology: v6e:2x2x1
jax: 0.10.0
libtpu: 0.0.40
codegen_flags: <defaults>
</compile_context>

<pallas_src>
import jax
import jax.numpy as jnp
from jax.experimental import pallas as pl
from jax.experimental.pallas import tpu as pltpu


def linear_kernel(x_ref, w_ref, b_ref, o_ref):
    # MXU matmul with f32 accumulation + VPU bias add, all in VMEM.
    x = x_ref[...]                         # (TB, 300)  batch tile (last block may be partial)
    w = w_ref[...]                         # (300, 4)   resident across grid steps
    b = b_ref[...]                         # (1, 4)     resident across grid steps
    acc = jnp.dot(x, w, preferred_element_type=jnp.float32)   # (TB, 4) f32
    o_ref[...] = (acc + b).astype(o_ref.dtype)


def _round_up(n, m):
    return ((n + m - 1) // m) * m


def logistic_regression_forward(x, w, b, *, tb=2048):
    """x: (B, 300) f32, w: (300, 4) f32, b: (4,) f32 -> (B, 4) f32."""
    B, D_in = x.shape
    D_out = w.shape[1]
    b2d = b.reshape(1, D_out)

    # Pick the batch tile.
    #  - Tiny batch (< 8 rows): one block equal to the full array (no (8,128)
    #    divisibility concern since block == array extent).
    #  - Otherwise: TB rows, but capped at round_up(cdiv(B, 2), 8) so the grid
    #    has >= 2 steps whenever possible (v7x megacore sharding + pipelining).
    #    No wrapper-side padding: Pallas handles the partial last block; rows
    #    are independent so the garbage tail of the last X tile is harmless and
    #    its output rows are never written back.
    if B <= 8:
        tb_eff = B
    else:
        tb_eff = min(tb, _round_up(pl.cdiv(B, 2), 8))
    grid = (pl.cdiv(B, tb_eff),)

    cost = pl.CostEstimate(
        flops=2 * B * D_in * D_out,
        transcendentals=0,
        bytes_accessed=(B * D_in + D_in * D_out + D_out + B * D_out) * 4,
    )

    out = pl.pallas_call(
        linear_kernel,
        out_shape=jax.ShapeDtypeStruct((B, D_out), x.dtype),
        grid=grid,
        in_specs=[
            # X: tiled over the batch grid axis -> double-buffered DMA pipeline.
            pl.BlockSpec((tb_eff, D_in), lambda i: (i, 0)),
            # W, bias: constant block index -> fetched once, VMEM-resident.
            pl.BlockSpec((D_in, D_out), lambda i: (0, 0)),
            pl.BlockSpec((1, D_out), lambda i: (0, 0)),
        ],
        out_specs=pl.BlockSpec((tb_eff, D_out), lambda i: (i, 0)),
        compiler_params=pltpu.CompilerParams(
            # Independent batch tiles: lets v7x shard the grid across its 2 TCs.
            dimension_semantics=("parallel",),
            # Explicit scoped-VMEM budget: ~8.5 MiB needed at TB=2048 (with lane
            # padding, double-buffered); 32 MiB gives headroom on every gen and
            # stays under v7x's 64 MiB-per-TC physical VMEM.
            vmem_limit_bytes=32 * 1024 * 1024,
        ),
        cost_estimate=cost,
    )(x, w, b2d)

    return out


if __name__ == "__main__":
    key = jax.random.PRNGKey(0)
    k_x, k_w, k_b, k_x2, k_x3 = jax.random.split(key, 5)

    B, D_in, D_out = 8, 300, 4

    # Deterministic parameter init (mimics torch.nn.Linear's uniform init bound).
    bound = 1.0 / jnp.sqrt(jnp.float32(D_in))
    w = jax.random.uniform(k_w, (D_in, D_out), jnp.float32, -bound, bound)
    b = jax.random.uniform(k_b, (D_out,), jnp.float32, -bound, bound)
    x = jax.random.normal(k_x, (B, D_in), jnp.float32)

    # Small-batch path (single grid step, block == full batch).
    out = jax.block_until_ready(logistic_regression_forward(x, w, b))
    ref = x @ w + b[None, :]
    assert out.shape == (B, D_out)
    assert jnp.allclose(out, ref, atol=1e-5, rtol=1e-5)

    # Multi-tile path with a ragged tail (regression test for partial-last-block
    # handling without wrapper-side padding): B=40, tb=16 -> grid=3, last block
    # has only 8 valid rows.
    B2 = 40
    x2 = jax.random.normal(k_x2, (B2, D_in), jnp.float32)
    out2 = jax.block_until_ready(logistic_regression_forward(x2, w, b, tb=16))
    ref2 = x2 @ w + b[None, :]
    assert out2.shape == (B2, D_out)
    assert jnp.allclose(out2, ref2, atol=1e-5, rtol=1e-5)

    # Tiny-batch path (B < 8: single full-extent block).
    B3 = 5
    x3 = jax.random.normal(k_x3, (B3, D_in), jnp.float32)
    out3 = jax.block_until_ready(logistic_regression_forward(x3, w, b))
    ref3 = x3 @ w + b[None, :]
    assert out3.shape == (B3, D_out)
    assert jnp.allclose(out3, ref3, atol=1e-5, rtol=1e-5)

    print("KERNEL_OK")
</pallas_src>

<mosaic_0001>
module attributes {stable_mosaic.version = 11 : i64} {
  func.func @linear_kernel(%arg0: i32, %arg1: memref<8x300xf32, #tpu.memory_space<vmem>>, %arg2: memref<300x4xf32, #tpu.memory_space<vmem>>, %arg3: memref<1x4xf32, #tpu.memory_space<vmem>>, %arg4: memref<8x4xf32, #tpu.memory_space<vmem>>) attributes {dimension_semantics = [#tpu.dimension_semantics<parallel>], iteration_bounds = array<i64: 1>, scalar_prefetch = 0 : i64, scratch_operands = 0 : i64, tpu.core_type = #tpu.core_type<tc>, window_params = [{transform_indices = @transform_0, window_bounds = array<i64: 8, 300>}, {pipeline_mode = #tpu.pipeline_mode<synchronous>, transform_indices = @transform_1, window_bounds = array<i64: 300, 4>}, {pipeline_mode = #tpu.pipeline_mode<synchronous>, transform_indices = @transform_2, window_bounds = array<i64: 1, 4>}, {transform_indices = @transform_3, window_bounds = array<i64: 8, 4>}]} {
    %c0 = arith.constant 0 : index
    %c0_0 = arith.constant 0 : index
    %0 = vector.load %arg1[%c0, %c0_0] : memref<8x300xf32, #tpu.memory_space<vmem>>, vector<8x300xf32>
    %c0_1 = arith.constant 0 : index
    %c0_2 = arith.constant 0 : index
    %1 = vector.load %arg2[%c0_1, %c0_2] : memref<300x4xf32, #tpu.memory_space<vmem>>, vector<300x4xf32>
    %c0_3 = arith.constant 0 : index
    %c0_4 = arith.constant 0 : index
    %2 = vector.load %arg3[%c0_3, %c0_4] : memref<1x4xf32, #tpu.memory_space<vmem>>, vector<1x4xf32>
    %cst = arith.constant dense<0.000000e+00> : vector<8x4xf32>
    %3 = tpu.matmul %0, %1, %cst {dimension_numbers = #tpu.dot_dimension_numbers<[1], [0], [0], [1], [0, 0, 1, 1], [], []>} : vector<8x300xf32>, vector<300x4xf32>, vector<8x4xf32> -> vector<8x4xf32>
    %4 = vector.broadcast %2 : vector<1x4xf32> to vector<8x4xf32>
    %5 = arith.addf %3, %4 : vector<8x4xf32>
    %c0_5 = arith.constant 0 : index
    %c0_6 = arith.constant 0 : index
    %6 = vector.load %arg4[%c0_5, %c0_6] : memref<8x4xf32, #tpu.memory_space<vmem>>, vector<8x4xf32>
    tpu.vector_store %arg4[%c0_5, %c0_6], %5 {strides = array<i32>} : memref<8x4xf32, #tpu.memory_space<vmem>>, vector<8x4xf32>,
    return
  }
  func.func @transform_0(%arg0: i32) -> (i32, i32) {
    %c0_i32 = arith.constant 0 : i32
    %c0_i32_0 = arith.constant 0 : i32
    return %arg0, %c0_i32 : i32, i32
  }
  func.func @transform_1(%arg0: i32) -> (i32, i32) {
    %c0_i32 = arith.constant 0 : i32
    %c0_i32_0 = arith.constant 0 : i32
    %c0_i32_1 = arith.constant 0 : i32
    return %c0_i32, %c0_i32_0 : i32, i32
  }
  func.func @transform_2(%arg0: i32) -> (i32, i32) {
    %c0_i32 = arith.constant 0 : i32
    %c0_i32_0 = arith.constant 0 : i32
    %c0_i32_1 = arith.constant 0 : i32
    return %c0_i32, %c0_i32_0 : i32, i32
  }
  func.func @transform_3(%arg0: i32) -> (i32, i32) {
    %c0_i32 = arith.constant 0 : i32
    %c0_i32_0 = arith.constant 0 : i32
    return %arg0, %c0_i32 : i32, i32
  }
}

</mosaic_0001>

<bundles_post_ra>
// kernel: tpu_custom_call.1
= control target key start
LH: loop header
LB: loop body
LE: loop exit
PB: predicated region body
PF: predicated region fallthrough
CT: control target
= control target key end

     0   :  { %v278_v3 = vmov 0.0   ;;  %vm279_vm0 = vmmov 0   ;;  %vm66_vm1 = vcmask 1043456   ;;  %vm62_vm2 = vcmask 359424   ;;  %s429_s1 = inlined_call_operand.vmem [shape: f32[300,4], index: 1, kind: input, shape index: {}]   ;;  %s430_s0 = inlined_call_operand.vmem [shape: f32[8,300], index: 0, kind: input, shape index: {}]   ;;  %s431_s2 = inlined_call_operand.vmem [shape: f32[1,4], index: 2, kind: input, shape index: {}]   ;;  %s432_s3 = inlined_call_operand.vmem [shape: f32[8,4], index: 3, kind: output, shape index: {}]  }
   0x1   :  { %v48_v0 = vld [vmem:[%s429_s1 + $0xf8] sm:$0xff]  ;;  %v47_v2 = vld [vmem:[%s429_s1 + $0xf0] sm:$0xff]  ;;  %261 = vmatprep.subr.mxu1 %v278_v3  ;;  %273 = vmatprep.mubr.msk.f32.mxu1 %vm279_vm0, %v278_v3  ;;  %v46_v5 = vld [vmem:[%s429_s1 + $0xe8] sm:$0xff]  ;;  %vm210_vm3 = vcmask 31744  }
   0x2   :  { %v32_v1 = vld [vmem:[%s429_s1 + $0x78] sm:$0xff]  ;;  %219 = vmatprep.subr.mxu0 %v48_v0  ;;  %v31_v4 = vld [vmem:[%s429_s1 + $0x70] sm:$0xff]  ;;  %v30_v6 = vld [vmem:[%s429_s1 + $0x68] sm:$0xff] }
   0x3   :  { %220 = vmatpush3.msra.mxu0 %v32_v1  ;;  %v45_v7 = vld [vmem:[%s429_s1 + $0xe0] sm:$0xff]  ;;  %v44_v9 = vld [vmem:[%s429_s1 + $0xd8] sm:$0xff]  ;;  %v43_v11 = vld [vmem:[%s429_s1 + $0xd0] sm:$0xff] }
   0x4   :  { %221 = vmatprep.subr.mxu0 %v47_v2  ;;  %v29_v8 = vld [vmem:[%s429_s1 + $0x60] sm:$0xff]  ;;  %v28_v10 = vld [vmem:[%s429_s1 + $0x58] sm:$0xff]  ;;  %v54_v12 = vld [vmem:[%s429_s1 + $0x128] sm:$0xf] }
   0x5   :  { %222 = vmatpush3.msra.mxu0 %v31_v4  ;;  %v27_v13 = vld [vmem:[%s429_s1 + $0x50] sm:$0xff]  ;;  %262 = vmatpush3.msk.msra.mxu1 %vm66_vm1, %v54_v12  ;;  %v53_v14 = vld [vmem:[%s429_s1 + $0x120] sm:$0xff]  ;;  %v42_v15 = vld [vmem:[%s429_s1 + $0xc8] sm:$0xff] }
   0x6   :  { %223 = vmatprep.subr.mxu0 %v46_v5  ;;  %263 = vmatprep.subr.mxu1 %v278_v3  ;;  %v52_v16 = vld [vmem:[%s429_s1 + $0x118] sm:$0xff]  ;;  %v26_v17 = vld [vmem:[%s429_s1 + $0x48] sm:$0xff]  ;;  %v41_v18 = vld [vmem:[%s429_s1 + $0xc0] sm:$0xff] }
   0x7   :  { %224 = vmatpush3.msra.mxu0 %v30_v6  ;;  %264 = vmatpush3.msra.mxu1 %v53_v14  ;;  %v15_v19 = vld [vmem:[%s430_s0 + $0x8] sm:$0xff]  ;;  %v25_v20 = vld [vmem:[%s429_s1 + $0x40] sm:$0xff]  ;;  %v51_v21 = vld [vmem:[%s429_s1 + $0x110] sm:$0xff] }
   0x8   :  { %225 = vmatprep.subr.mxu0 %v45_v7  ;;  %265 = vmatprep.subr.mxu1 %v278_v3  ;;  %v40_v22 = vld [vmem:[%s429_s1 + $0xb8] sm:$0xff]  ;;  %v50_v24 = vld [vmem:[%s429_s1 + $0x108] sm:$0xff]  ;;  %v39_v25 = vld [vmem:[%s429_s1 + $0xb0] sm:$0xff] }
   0x9   :  { %226 = vmatpush3.msra.mxu0 %v29_v8  ;;  %266 = vmatpush3.msra.mxu1 %v52_v16  ;;  %v24_v23 = vld [vmem:[%s429_s1 + $0x38] sm:$0xff]  ;;  %v23_v26 = vld [vmem:[%s429_s1 + $0x30] sm:$0xff]  ;;  %v49_v27 = vld [vmem:[%s429_s1 + $0x100] sm:$0xff] }
   0xa   :  { %227 = vmatprep.subr.mxu0 %v44_v9  ;;  %267 = vmatprep.subr.mxu1 %v278_v3  ;;  %v38_v28 = vld [vmem:[%s429_s1 + $0xa8] sm:$0xff]  ;;  %v16_v29 = vld [vmem:[%s430_s0 + $0x10] sm:$0xff]  ;;  %v37_v31 = vld [vmem:[%s429_s1 + $0xa0] sm:$0xff] }
   0xb   :  { %228 = vmatpush3.msra.mxu0 %v28_v10  ;;  %134 = vmatprep.mubr.f32.mxu0 %v15_v19  ;;  %v22_v30 = vld [vmem:[%s429_s1 + $0x28] sm:$0xff]  ;;  %v21_v32 = vld [vmem:[%s429_s1 + $0x20] sm:$0xff]  ;;  %v36_v33 = vld [vmem:[%s429_s1 + $0x98] sm:$0xff] }
   0xc   :  { %229 = vmatprep.subr.mxu0 %v43_v11  ;;  %268 = vmatpush3.msra.mxu1 %v51_v21  ;;  %v20_v34 = vld [vmem:[%s429_s1 + $0x18] sm:$0xff]  ;;  %v35_v35 = vld [vmem:[%s429_s1 + $0x90] sm:$0xff]  ;;  %v34_v37 = vld [vmem:[%s429_s1 + $0x88] sm:$0xff] }
   0xd   :  { %230 = vmatpush3.msra.mxu0 %v27_v13  ;;  %269 = vmatprep.subr.mxu1 %v278_v3  ;;  %v19_v36 = vld [vmem:[%s429_s1 + $0x10] sm:$0xff]  ;;  %v18_v38 = vld [vmem:[%s429_s1 + $0x8] sm:$0xff]  ;;  %v33_v39 = vld [vmem:[%s429_s1 + $0x80] sm:$0xff] }
   0xe   :  { %231 = vmatprep.subr.mxu0 %v42_v15  ;;  %270 = vmatpush3.msra.mxu1 %v50_v24  ;;  %v17_v40 = vld [vmem:[%s429_s1] sm:$0xff] }
   0xf   :  { %232 = vmatpush3.msra.mxu0 %v26_v17  ;;  %271 = vmatprep.subr.mxu1 %v278_v3  ;;  %v14_v41 = vld [vmem:[%s430_s0] sm:$0xff] }
  0x10   :  { %233 = vmatprep.subr.mxu0 %v41_v18  ;;  %272 = vmatpush3.msra.mxu1 %v49_v27  ;;  %v216_v46 = vld [vmem:[%s431_s2] ss:$0 sm:$0xff] }
  0x11   :  { %234 = vmatpush3.msra.mxu0 %v25_v20  ;;  %274 = vmatmul.mubr.msk.f32.vlgmr.msra.gmra.mxu1 %vm62_vm2, %v16_v29 }
  0x12   :  { %235 = vmatprep.subr.mxu0 %v40_v22 }
  0x13   :  { %236 = vmatpush3.msra.mxu0 %v24_v23 }
  0x14   :  { %237 = vmatprep.subr.mxu0 %v39_v25 }
  0x15   :  { %238 = vmatpush3.msra.mxu0 %v23_v26 }
  0x16   :  { %239 = vmatprep.subr.mxu0 %v38_v28 }
  0x17   :  { %240 = vmatpush3.msra.mxu0 %v22_v30 }
  0x18   :  { %241 = vmatprep.subr.mxu0 %v37_v31 }
  0x19   :  { %242 = vmatpush3.msra.mxu0 %v21_v32 }
  0x1a   :  { %243 = vmatprep.subr.mxu0 %v36_v33 }
  0x1b   :  { %244 = vmatpush3.msra.mxu0 %v20_v34 }
  0x1c   :  { %245 = vmatprep.subr.mxu0 %v35_v35 }
  0x1d   :  { %246 = vmatpush3.msra.mxu0 %v19_v36 }
  0x1e   :  { %247 = vmatprep.subr.mxu0 %v34_v37 }
  0x1f   :  { %248 = vmatpush3.msra.mxu0 %v18_v38 }
  0x20   :  { %249 = vmatprep.subr.mxu0 %v33_v39 }
  0x21   :  { %250 = vmatpush3.msra.mxu0 %v17_v40 }
  0x22   :  { %135 = vmatmul.mubr.f32.vlgmr.msra.gmra.mxu0 %v14_v41 }
  0xd1   :  { %v206_v42 = vpop.f32.mrf.mxu1 }
  0xd3   :  { %v275_v43 = vpop.f32.mrf.mxu1 }
  0xe2   :  { %v251_v44 = vpop.f32.mrf.mxu0 }
  0xe4   :  { %v252_v45 = vpop.f32.mrf.mxu0 }
  0xe5   :  { %v253_v47 = vadd.f32 %v252_v45, %v251_v44 }
  0xe7   :  { %v137_v48 = vadd.f32 %v253_v47, %v216_v46 }
  0xe9   :  { %v207_v49 = vadd.f32 %v206_v42, %v137_v48 }
  0xeb   :  { %211 = vst.msk [vmem:[%s432_s3] sm:$0xff] %vm210_vm3, %v207_v49 }

</bundles_post_ra>
